<compile_context>
chip_gen: v7x
topology: tpu7x:2x2x1
jax: 0.10.0
libtpu: 0.0.40
codegen_flags: <defaults>
</compile_context>

<pallas_src>
import jax
import jax.numpy as jnp
from jax.experimental import pallas as pl
from jax.experimental.pallas import tpu as pltpu


# ----------------------------- small helpers -----------------------------
def _pick_row_tile(n, max_tile=512):
    """Largest row tile (multiple of 8 or full extent) that divides n."""
    if n <= max_tile:
        return n
    for cand in range(max_tile, 7, -8):
        if n % cand == 0:
            return cand
    return n


def _pick_time_chunk(T, requested=None, max_chunk=16):
    """A time-chunk length that divides T (prefer the requested one)."""
    if requested is not None and requested > 0 and T % requested == 0:
        return requested
    for cand in range(min(T, max_chunk), 0, -1):
        if T % cand == 0:
            return cand
    return T


# ----------------------------- Kernel A: hoisted input projection -----------------------------
def _input_proj_kernel(x_ref, w_ref, b_ref, g_ref):
    # x: [TN, Cin], w: [Cin, 4H], b: [1, 4H]  ->  g: [TN, 4H]
    g_ref[...] = (jnp.dot(x_ref[...], w_ref[...], preferred_element_type=jnp.float32)
                  + b_ref[...])


def input_projection_pallas(x2d, w_ih, b_ih):
    """x2d: [N, Cin], w_ih: [2, Cin, 4H], b_ih: [2, 1, 4H] -> g: [2, N, 4H]."""
    N, Cin = x2d.shape
    G = w_ih.shape[-1]
    tn = _pick_row_tile(N)
    return pl.pallas_call(
        _input_proj_kernel,
        out_shape=jax.ShapeDtypeStruct((2, N, G), jnp.float32),
        grid_spec=pltpu.PrefetchScalarGridSpec(
            num_scalar_prefetch=0,
            grid=(2, N // tn),
            in_specs=[
                pl.BlockSpec((tn, Cin), lambda d, r: (r, 0)),
                pl.BlockSpec((None, Cin, G), lambda d, r: (d, 0, 0)),
                pl.BlockSpec((None, 1, G), lambda d, r: (d, 0, 0)),
            ],
            out_specs=pl.BlockSpec((None, tn, G), lambda d, r: (d, r, 0)),
        ),
        compiler_params=pltpu.CompilerParams(
            dimension_semantics=("parallel", "parallel"),
            vmem_limit_bytes=32 * 1024 * 1024),
    )(x2d, w_ih, b_ih)


# ----------------------------- Kernel B: BiLSTM recurrence -----------------------------
def _make_recurrence_kernel(t_chunk, hidden):
    TC, H = t_chunk, hidden

    def kernel(g_ref, w_ref, h_out_ref, h_sc, c_sc):
        # g_ref:     [TC, B, 4H]  precomputed x @ W_ih + b for this direction / chunk
        # w_ref:     [H, 4H]      recurrent weights for this direction
        # h_out_ref: [TC, B, H]
        d = pl.program_id(0)   # 0 = forward, 1 = backward
        c = pl.program_id(1)   # chunk index along the (direction-reordered) time axis

        @pl.when(c == 0)
        def _():
            h_sc[...] = jnp.zeros_like(h_sc)
            c_sc[...] = jnp.zeros_like(c_sc)

        def step(i, carry):
            # local time index inside the chunk: ascending for fwd, descending for bwd
            li = d * (TC - 1 - i) + (1 - d) * i
            gates = g_ref[li] + jnp.dot(h_sc[...], w_ref[...],
                                        preferred_element_type=jnp.float32)
            # PyTorch LSTM gate order: [i, f, g, o]
            # TODO(synk): with H < 128 these gate slices are lane-unaligned; a [4, B, H]
            # gate layout would keep them on full tiles for large-H production shapes.
            i_g = jax.nn.sigmoid(gates[:, 0 * H:1 * H])
            f_g = jax.nn.sigmoid(gates[:, 1 * H:2 * H])
            g_g = jnp.tanh(gates[:, 2 * H:3 * H])
            o_g = jax.nn.sigmoid(gates[:, 3 * H:4 * H])
            c_new = f_g * c_sc[...] + i_g * g_g
            h_new = o_g * jnp.tanh(c_new)
            c_sc[...] = c_new
            h_sc[...] = h_new
            h_out_ref[li] = h_new
            return carry

        jax.lax.fori_loop(0, TC, step, 0, unroll=True)

    return kernel


def bilstm_recurrence_pallas(g_seq, w_hh, *, t_chunk=None):
    """g_seq: [2, T, B, 4H] precomputed gate inputs, w_hh: [2, H, 4H] -> h: [2, T, B, H]."""
    _, T, B, G = g_seq.shape
    H = w_hh.shape[1]
    tc = _pick_time_chunk(T, t_chunk)
    nc = T // tc

    def tmap(d, c):
        # forward (d=0) walks chunks 0..nc-1; backward (d=1) walks nc-1..0
        return (d, d * (nc - 1 - c) + (1 - d) * c, 0, 0)

    return pl.pallas_call(
        _make_recurrence_kernel(tc, H),
        out_shape=jax.ShapeDtypeStruct((2, T, B, H), jnp.float32),
        grid_spec=pltpu.PrefetchScalarGridSpec(
            num_scalar_prefetch=0,
            grid=(2, nc),
            in_specs=[
                pl.BlockSpec((None, tc, B, G), tmap),
                pl.BlockSpec((None, H, G), lambda d, c: (d, 0, 0)),
            ],
            out_specs=pl.BlockSpec((None, tc, B, H), tmap),
            scratch_shapes=[pltpu.VMEM((B, H), jnp.float32),
                            pltpu.VMEM((B, H), jnp.float32)],
        ),
        compiler_params=pltpu.CompilerParams(
            # direction axis is independent -> shardable across the 2 TCs on v7x;
            # time-chunk axis is the sequential recurrence.
            dimension_semantics=("parallel", "arbitrary"),
            vmem_limit_bytes=32 * 1024 * 1024),
    )(g_seq, w_hh)


# ----------------------------- Kernel C: fused output Linear (no concat) -----------------------------
def _bidir_linear_kernel(h_ref, w_ref, b_ref, y_ref):
    # h: [2, TN, H], w: [2, H, M], b: [1, M] -> y: [TN, M]
    y_ref[...] = (jnp.dot(h_ref[0], w_ref[0], preferred_element_type=jnp.float32)
                  + jnp.dot(h_ref[1], w_ref[1], preferred_element_type=jnp.float32)
                  + b_ref[...])


def bidir_linear_pallas(h2, w2, b):
    """h2: [2, N, H], w2: [2, H, M], b: [1, M] -> y: [N, M] = hf@W_top + hb@W_bot + b."""
    _, N, H = h2.shape
    M = w2.shape[-1]
    tn = _pick_row_tile(N)
    return pl.pallas_call(
        _bidir_linear_kernel,
        out_shape=jax.ShapeDtypeStruct((N, M), jnp.float32),
        grid_spec=pltpu.PrefetchScalarGridSpec(
            num_scalar_prefetch=0,
            grid=(N // tn,),
            in_specs=[
                pl.BlockSpec((2, tn, H), lambda r: (0, r, 0)),
                pl.BlockSpec((2, H, M), lambda r: (0, 0, 0)),
                pl.BlockSpec((1, M), lambda r: (0, 0)),
            ],
            out_specs=pl.BlockSpec((tn, M), lambda r: (r, 0)),
        ),
        compiler_params=pltpu.CompilerParams(
            dimension_semantics=("parallel",),
            vmem_limit_bytes=32 * 1024 * 1024),
    )(h2, w2, b)


# ----------------------------- Full module forward -----------------------------
def bidirectional_lstm_forward(x, params, *, t_chunk=None):
    T, B, Cin = x.shape
    H = params["w_hh_f"].shape[0]

    # Stack per-direction parameters once (dir 0 = forward, dir 1 = backward).
    w_ih = jnp.stack([params["w_ih_f"], params["w_ih_b"]])   # [2, Cin, 4H]
    b_ih = jnp.stack([params["b_f"], params["b_b"]])         # [2, 1, 4H]
    w_hh = jnp.stack([params["w_hh_f"], params["w_hh_b"]])   # [2, H, 4H]

    # Kernel A: one large, pipelineable matmul for all timesteps of both directions.
    g2d = input_projection_pallas(x.reshape(T * B, Cin), w_ih, b_ih)   # [2, T*B, 4H]
    g_seq = g2d.reshape(2, T, B, 4 * H)

    # Kernel B: sequential recurrence (only h @ W_hh + elementwise per step).
    h_seq = bilstm_recurrence_pallas(g_seq, w_hh, t_chunk=t_chunk)     # [2, T, B, H]

    # Kernel C: y = hf @ W_top + hb @ W_bot + b  (no [T, B, 2H] concat materialized).
    w2 = params["w_emb"].reshape(2, H, -1)                             # [2, H, M]
    y2d = bidir_linear_pallas(h_seq.reshape(2, T * B, H), w2, params["b_emb"])
    return y2d.reshape(T, B, -1)


# ----------------------------- Parameter init & reference -----------------------------
def init_params(key, in_features, hidden, out_features):
    ks = jax.random.split(key, 8)
    s = 1.0 / jnp.sqrt(jnp.float32(hidden))

    def u(k, shape):
        return jax.random.uniform(k, shape, jnp.float32, -s, s)

    G = 4 * hidden
    return {
        # stored transposed vs. PyTorch (kernels compute x @ W^T as x @ w)
        "w_ih_f": u(ks[0], (in_features, G)),
        "w_hh_f": u(ks[1], (hidden, G)),
        "b_f":    u(ks[2], (1, G)),       # b_ih + b_hh folded into one bias
        "w_ih_b": u(ks[3], (in_features, G)),
        "w_hh_b": u(ks[4], (hidden, G)),
        "b_b":    u(ks[5], (1, G)),
        "w_emb":  u(ks[6], (2 * hidden, out_features)),
        "b_emb":  u(ks[7], (1, out_features)),
    }


def _reference_forward(x, params, hidden):
    H = hidden

    def lstm_dir(x_seq, w_ih, w_hh, b):
        B = x_seq.shape[1]

        def step(carry, x_t):
            h, c = carry
            gates = x_t @ w_ih + h @ w_hh + b
            i = jax.nn.sigmoid(gates[:, 0 * H:1 * H])
            f = jax.nn.sigmoid(gates[:, 1 * H:2 * H])
            g = jnp.tanh(gates[:, 2 * H:3 * H])
            o = jax.nn.sigmoid(gates[:, 3 * H:4 * H])
            c = f * c + i * g
            h = o * jnp.tanh(c)
            return (h, c), h

        init = (jnp.zeros((B, H), jnp.float32), jnp.zeros((B, H), jnp.float32))
        _, hs = jax.lax.scan(step, init, x_seq)
        return hs

    hf = lstm_dir(x, params["w_ih_f"], params["w_hh_f"], params["b_f"])
    hb = lstm_dir(x[::-1], params["w_ih_b"], params["w_hh_b"], params["b_b"])[::-1]
    h = jnp.concatenate([hf, hb], axis=-1)
    T, B, C = h.shape
    y = h.reshape(T * B, C) @ params["w_emb"] + params["b_emb"]
    return y.reshape(T, B, -1)


if __name__ == "__main__":
    T, B = 8, 2
    in_features, hidden, out_features = 16, 32, 16

    key = jax.random.PRNGKey(0)
    kx, kp = jax.random.split(key)
    x = jax.random.normal(kx, (T, B, in_features), jnp.float32)
    params = init_params(kp, in_features, hidden, out_features)

    # t_chunk=4 -> 2 time chunks per direction, exercising the (h, c) carry across grid steps.
    y = bidirectional_lstm_forward(x, params, t_chunk=4)
    y = jax.block_until_ready(y)

    y_ref = _reference_forward(x, params, hidden)
    assert y.shape == (T, B, out_features)
    assert jnp.allclose(y, y_ref, atol=2e-4, rtol=2e-4), "mismatch vs JAX reference"

    print("KERNEL_OK")
</pallas_src>

<mosaic_0001>
module attributes {stable_mosaic.version = 11 : i64} {
  func.func @_input_proj_kernel(%arg0: i32, %arg1: i32, %arg2: memref<16x16xf32, #tpu.memory_space<vmem>>, %arg3: memref<1x16x128xf32, #tpu.memory_space<vmem>>, %arg4: memref<1x1x128xf32, #tpu.memory_space<vmem>>, %arg5: memref<1x16x128xf32, #tpu.memory_space<vmem>>) attributes {dimension_semantics = [#tpu.dimension_semantics<parallel>, #tpu.dimension_semantics<parallel>], iteration_bounds = array<i64: 2, 1>, scalar_prefetch = 0 : i64, scratch_operands = 0 : i64, tpu.core_type = #tpu.core_type<tc>, window_params = [{transform_indices = @transform_0, window_bounds = array<i64: 16, 16>}, {transform_indices = @transform_1, window_bounds = array<i64: 1, 16, 128>}, {transform_indices = @transform_2, window_bounds = array<i64: 1, 1, 128>}, {transform_indices = @transform_3, window_bounds = array<i64: 1, 16, 128>}]} {
    %c0 = arith.constant 0 : index
    %c0_0 = arith.constant 0 : index
    %0 = vector.load %arg2[%c0, %c0_0] : memref<16x16xf32, #tpu.memory_space<vmem>>, vector<16x16xf32>
    %c0_1 = arith.constant 0 : index
    %c0_2 = arith.constant 0 : index
    %c0_3 = arith.constant 0 : index
    %1 = vector.load %arg3[%c0_1, %c0_2, %c0_3] : memref<1x16x128xf32, #tpu.memory_space<vmem>>, vector<1x16x128xf32>
    %2 = vector.shape_cast %1 : vector<1x16x128xf32> to vector<16x128xf32>
    %cst = arith.constant dense<0.000000e+00> : vector<16x128xf32>
    %3 = tpu.matmul %0, %2, %cst {dimension_numbers = #tpu.dot_dimension_numbers<[1], [0], [0], [1], [0, 0, 1, 1], [], []>} : vector<16x16xf32>, vector<16x128xf32>, vector<16x128xf32> -> vector<16x128xf32>
    %c0_4 = arith.constant 0 : index
    %c0_5 = arith.constant 0 : index
    %c0_6 = arith.constant 0 : index
    %4 = vector.load %arg4[%c0_4, %c0_5, %c0_6] : memref<1x1x128xf32, #tpu.memory_space<vmem>>, vector<1x1x128xf32>
    %5 = vector.shape_cast %4 : vector<1x1x128xf32> to vector<1x128xf32>
    %6 = vector.broadcast %5 : vector<1x128xf32> to vector<16x128xf32>
    %7 = arith.addf %3, %6 : vector<16x128xf32>
    %c0_7 = arith.constant 0 : index
    %c0_8 = arith.constant 0 : index
    %c0_9 = arith.constant 0 : index
    %8 = vector.load %arg5[%c0_7, %c0_8, %c0_9] : memref<1x16x128xf32, #tpu.memory_space<vmem>>, vector<1x16x128xf32>
    %9 = vector.shape_cast %8 : vector<1x16x128xf32> to vector<16x128xf32>
    %10 = vector.shape_cast %7 : vector<16x128xf32> to vector<1x16x128xf32>
    tpu.vector_store %arg5[%c0_7, %c0_8, %c0_9], %10 {strides = array<i32>} : memref<1x16x128xf32, #tpu.memory_space<vmem>>, vector<1x16x128xf32>,
    return
  }
  func.func @transform_0(%arg0: i32, %arg1: i32) -> (i32, i32) {
    %c0_i32 = arith.constant 0 : i32
    %c0_i32_0 = arith.constant 0 : i32
    return %arg1, %c0_i32 : i32, i32
  }
  func.func @transform_1(%arg0: i32, %arg1: i32) -> (i32, i32, i32) {
    %c0_i32 = arith.constant 0 : i32
    %c0_i32_0 = arith.constant 0 : i32
    %c0_i32_1 = arith.constant 0 : i32
    return %arg0, %c0_i32, %c0_i32_0 : i32, i32, i32
  }
  func.func @transform_2(%arg0: i32, %arg1: i32) -> (i32, i32, i32) {
    %c0_i32 = arith.constant 0 : i32
    %c0_i32_0 = arith.constant 0 : i32
    %c0_i32_1 = arith.constant 0 : i32
    return %arg0, %c0_i32, %c0_i32_0 : i32, i32, i32
  }
  func.func @transform_3(%arg0: i32, %arg1: i32) -> (i32, i32, i32) {
    %c0_i32 = arith.constant 0 : i32
    %c0_i32_0 = arith.constant 0 : i32
    return %arg0, %arg1, %c0_i32 : i32, i32, i32
  }
}

</mosaic_0001>

<bundles_post_ra>
// kernel: tpu_custom_call.1
= control target key start
LH: loop header
LB: loop body
LE: loop exit
PB: predicated region body
PF: predicated region fallthrough
CT: control target
= control target key end

     0   :  { %8 = vsyncpa [#allocation3], 0  ;;  %s977_s0 = inlined_call_operand.hbm [shape: f32[16,16], index: 0, kind: input, shape index: {}]   ;;  %s978_s1 = inlined_call_operand.hbm [shape: f32[2,16,128], index: 1, kind: input, shape index: {}]   ;;  %s979_s2 = inlined_call_operand.vmem [shape: f32[2,1,128], index: 2, kind: input, shape index: {}]   ;;  %s980_s3 = inlined_call_operand.hbm [shape: f32[2,16,128], index: 3, kind: output, shape index: {}]  }
   0x1   :  { %9 = vsyncpa [#allocation6], 0 }
   0x2   :  { %11 = vsyncpa [#allocation6 + $0x1], 0 }
   0x3   :  { %12 = vsyncpa [#allocation4], 0 }
   0x4   :  { %14 = vsyncpa [#allocation4 + $0x1], 0  ;;  %s747_s12 = smov 0   ;;  %s749_s13 = smov 0  }
   0x5   :  { %s751_s14 = smov 0   ;;  %s753_s15 = smov 0  }
   0x6   :  { %s755_s16 = smov 0   ;;  %s757_s17 = smov 0  }
   0x7 LB: > { %s460_s18 = sadd.s32 4294967295, %s718_s17   ;;  %s461_s19 = sadd.s32 4294967294, %s718_s17   ;;  %s718_s17 = sphi %s757_s17, %s20_s17   ;;  %s714_s16 = sphi %s755_s16, %s1004_s16   ;;  %s710_s15 = sphi %s753_s15, %s1003_s15   ;;  %s706_s14 = sphi %s751_s14, %s1002_s14   ;;  %s702_s13 = sphi %s749_s13, %s1001_s13   ;;  %s698_s12 = sphi %s747_s12, %s1000_s12  }
   0x8   : > { %p78_p0 = scmp.ne.s32.totalorder %s702_s13, %s698_s12  ;;  %p781_p1 = scmp.eq.s32.totalorder %s460_s18, 0 }
   0x9   : > { %p785_p2 = scmp.eq.s32.totalorder %s460_s18, 1  ;;  %p136_p3 = scmp.eq.s32.totalorder %s461_s19, 1 }
   0xa   : > { %s985_s20 = scalar_select %p781_p1, 1, 0 }
   0xb   : > { %s986_s21 = scalar_select %p785_p2, 1, 0 }
   0xc   : > { %p791_p4 = por %p781_p1, %p78_p0  ;;  %p462_p5 = scmp.ge.s32.totalorder %s718_s17, 1 }
   0xd   : > { %p796_p6 = por %p136_p3, %p78_p0  ;;  %p143_p7 = scmp.lt.s32.totalorder %s718_s17, 3 }
   0xe   : > { %s987_s22 = scalar_select %p791_p4, 1, 0 }
   0xf   : > { %s988_s23 = scalar_select %p796_p6, 1, 0 }
  0x10   : > { %p801_p8 = pnand %p462_p5, %p143_p7  ;;  %s720_s25 = smov [#allocation2]  }
  0x11   : > { %s158_s26 = sshll.u32 %s720_s25, 4  ;;  %s32_s28 = sadd.s32 1, %s714_s16  ;;  %s159_s26 = int_to_ptr.vmem [resolvable:$true] %s158_s26 }
  0x12   : > { %s989_s24 = scalar_select %p801_p8, 1, 0 }
  0x13   : > { %p505_p9 = pneg %p801_p8  ;;  %s574_s4 = scalar_lea.hbm %s977_s0, 256 }
  0x14   : > { %p575_p12 = scmp.ne.s32.totalorder %s977_s0, %s574_s4  ;;  %p581_p5 = scmp.lt.u32.totalorder %s574_s4, %s977_s0 }
  0x15   : > { %p810_p11 = pnand %p505_p9, %p781_p1 }
  0x17   : > { %p576_p13 = pneg %p810_p11 }
  0x19   : > { %p577_p0 = pnand %p576_p13, %p575_p12 }
  0x1b   : > { %p578_p3 = pneg %p577_p0 }
  0x1d   : > { %p583_p7 = pnand %p581_p5, %p578_p3 }
  0x1f   : > { %586 = shalt.err (!%p583_p7)
}
  0x20   : > { %s587_s9 = scalar_lea.vmem %s159_s26, 256  ;;  %p595_p4 = scmp.lt.s32.totalorder %s159_s26, %s159_s26 }
  0x21   : > { %p588_p9 = scmp.ne.s32.totalorder %s159_s26, %s587_s9  ;;  %p596_p1 = scmp.lt.s32.totalorder %s587_s9, %s587_s9 }
  0x23   : > { %p590_p10 = pnand %p588_p9, %p576_p13  ;;  %p597_p8 = por %p596_p1, %p595_p4 }
  0x25   : > { %p591_p6 = pneg %p590_p10 }
  0x27   : > { %p598_p2 = pnand %p597_p8, %p591_p6 }
  0x29   : > { %601 = shalt.err (!%p598_p2)
}
  0x2a   : > { %s721_s10 = smov 128   ;;  %s722_s11 = smov 8  }
  0x2b   : > { %508 = dma.hbm_to_vmem [thread:$0]  (!%p810_p11), %s977_s0, 256, %s159_s26, [#allocation3], %s721_s10, %s721_s10, %s722_s11  }
  0x2c   : > { %p34_p1 = scmp.ge.s32.totalorder %s32_s28, 2  ;;  %s65_s25 = sadd.s32 1, %s706_s14 }
  0x2d   : > { %p72_p2 = scmp.ne.s32.totalorder %s706_s14, %s702_s13  ;;  %p73_p4 = scmp.eq.s32.totalorder %s718_s17, 0 }
  0x2e   : > { %s1006_s28 = smov (%p34_p1, %s32_s28), 0  ;;  %p992_p8 = scmp.ne.s32.totalorder %s986_s21, 0 }
  0x2f   : > { %p840_p6 = por %p73_p4, %p72_p2  ;;  %s62_s30 = ssub.s32 %s714_s16, %s1006_s28 }
  0x30   : > { %p846_p10 = por %p992_p8, %p72_p2  ;;  %p518_p12 = scmp.lt.s32.totalorder %s718_s17, 2 }
  0x31   : > { %p63_p11 = scmp.eq.s32.totalorder %s62_s30, 0  ;;  %s172_s26 = sand.u32 1, %s706_s14  }
  0x32   : > { %s465_s4 = sshll.u32 %s172_s26, 4  ;;  %s480_s6 = sshll.u32 %s714_s16, 8 }
  0x33   : > { %s855_s5 = scalar_select %p63_p11, %s706_s14, %s65_s25  }
  0x34   : > { %s861_s9 = scalar_lea.hbm %s978_s1, %s480_s6  ;;  %s176_s21 = scalar_lea.vmem [#allocation5], %s465_s4 }
  0x35   : > { %s183_s18 = sshll.u32 %s176_s21, 4  ;;  %p867_p13 = pnand %p518_p12, %p840_p6  ;;  %s863_s18 = int_to_ptr.vmem [resolvable:$true] %s183_s18 }
  0x36   : > { %s871_s25 = scalar_lea.sflag [#allocation6], %s172_s26  ;;  %s602_s30 = scalar_lea.hbm %s861_s9, 256 }
  0x37   : > { %p603_p0 = scmp.ne.s32.totalorder %s861_s9, %s602_s30  ;;  %p604_p3 = pneg %p867_p13 }
  0x38   : > { %s607_s29 = scalar_lea.hbm %s978_s1, 512  ;;  %p608_p9 = scmp.lt.u32.totalorder %s861_s9, %s978_s1 }
  0x39   : > { %p605_p5 = pnand %p604_p3, %p603_p0  ;;  %p609_p1 = scmp.lt.u32.totalorder %s607_s29, %s602_s30 }
  0x3a   : > { %p611_p4 = scmp.lt.u32.totalorder %s602_s30, %s861_s9 }
  0x3b   : > { %p606_p7 = pneg %p605_p5  ;;  %p610_p2 = por %p609_p1, %p608_p9 }
  0x3d   : > { %p612_p6 = por %p611_p4, %p610_p2 }
  0x3f   : > { %p613_p8 = pnand %p612_p6, %p606_p7 }
  0x41   : > { %616 = shalt.err (!%p613_p8)
}
  0x42   : > { %s617_s26 = scalar_lea.vmem %s863_s18, 256  ;;  %s723_s21 = smov [#allocation5]  }
  0x43   : > { %p618_p12 = scmp.ne.s32.totalorder %s863_s18, %s617_s26  ;;  %s622_s4 = sshll.u32 %s723_s21, 4  ;;  %s623_s4 = int_to_ptr.vmem [resolvable:$false] %s622_s4 }
  0x44   : > { %s624_s6 = scalar_lea.vmem %s623_s4, 512  ;;  %p625_p5 = scmp.lt.s32.totalorder %s863_s18, %s623_s4 }
  0x45   : > { %p620_p11 = pnand %p618_p12, %p604_p3  ;;  %p626_p9 = scmp.lt.s32.totalorder %s624_s6, %s617_s26 }
  0x47   : > { %p621_p0 = pneg %p620_p11  ;;  %p627_p1 = por %p626_p9, %p625_p5 }
  0x49   : > { %p628_p2 = pnand %p627_p1, %p621_p0 }
  0x4b   : > { %631 = shalt.err (!%p628_p2)
}
  0x4c   : > { %512 = dma.hbm_to_vmem [thread:$0]  (!%p867_p13), %s861_s9, 256, %s863_s18, %s871_s25, %s721_s10, %s721_s10, %s722_s11  }
  0x4d   : > { %p995_p3 = scmp.ne.s32.totalorder %s989_s24, 0 }
  0x4e   : > { %p996_p7 = scmp.ne.s32.totalorder (!%p995_p3), %s985_s20, 0 }
  0x4f   : > { %201 = sbr.rel (%p995_p3) target bundleno = 328 (0x148), region = 32 }
  0x56   : > { %685 = dma.done.wait (%p996_p7), [#allocation3], 256  }
  0x57   : > { %687 = vsyncadd (%p996_p7), [#allocation3], 4294967040  ;;  %s909_s30 = sand.u32 1, %s702_s13   ;;  %p997_p4 = scmp.ne.s32.totalorder %s987_s22, 0 }
  0x58   : > { %s470_s19 = sshll.u32 %s909_s30, 4  ;;  %s208_s29 = scalar_lea.sflag [#allocation6], %s909_s30 }
  0x59   : > { %s211_s7 = scalar_lea.vmem [#allocation5], %s470_s19 }
  0x5a   : > { %689 = dma.done.wait (%p997_p4), %s208_s29, 256  }
  0x5b   : > { %691 = vsyncadd (%p997_p4), %s208_s29, 4294967040  ;;  %vm253_vm0 = vcmask 130048   ;;  %v244_v0 = vld [vmem:[%s211_s7] sm:$0xff]  ;;  %v245_v1 = vld [vmem:[%s211_s7 + $0x8] sm:$0xff]  ;;  %p238_p13 = scmp.lt.s32.totalorder %s710_s15, 1  ;;  %s236_s11 = scalar_lea.vmem [#allocation7], %s470_s19 }
  0x5c   : > { %v242_v2 = vld [vmem:[#allocation2] sm:$0xff]  ;;  %v493_v3 = vpack.c.bf16 %v245_v1, %v244_v0  ;;  %v243_v4 = vld [vmem:[#allocation2 + $0x8] sm:$0xff]  ;;  %s353_s9 = sshll.u32 %s236_s11, 4  ;;  %s481_s18 = sshll.u32 %s710_s15, 8  ;;  %s923_s9 = int_to_ptr.vmem [resolvable:$true] %s353_s9 }
  0x5d   : > { %490 = vmatprep.mubr.msk.f32.mxu0 %vm253_vm0, %v242_v2  ;;  %s239_s20 = scalar_select %p238_p13, %s710_s15, 1 }
  0x5e   : > { %494 = vmatprep.subr.bf16.mxu0 %v493_v3  ;;  %s928_s26 = scalar_lea.hbm %s980_s3, %s481_s18  ;;  %s338_s21 = scalar_lea.sflag [#allocation4], %s909_s30 }
  0x5f   : > { %496 = vmatpush3.bf16.msra.mxu0 %v493_v3  ;;  %s240_s22 = scalar_lea.vmem %s979_s2, %s239_s20  ;;  %s632_s4 = scalar_lea.vmem %s923_s9, 256 }
  0x60   : > { %v472_v5 = vld [vmem:[%s240_s22] ss:$0 sm:$0xff]  ;;  %p633_p6 = scmp.ne.s32.totalorder %s923_s9, %s632_s4  ;;  %s724_s15 = smov [#allocation7]  }
  0x61   : > { %s636_s6 = sshll.u32 %s724_s15, 4  ;;  %s637_s6 = int_to_ptr.vmem [resolvable:$false] %s636_s6 }
  0x62   : > { %491 = vmatmul.mubr.msk.f32.vlgmr.msra.gmra.mrb[0].mxu0 %vm253_vm0, %v243_v4  ;;  %p634_p8 = pnand %p633_p6, %p846_p10  ;;  %s638_s19 = scalar_lea.vmem %s637_s6, 512 }
  0x63   : > { %p639_p11 = scmp.lt.s32.totalorder %s923_s9, %s637_s6  ;;  %p640_p0 = scmp.lt.s32.totalorder %s638_s19, %s632_s4 }
  0x64   : > { %p635_p12 = pneg %p634_p8 }
  0x65   : > { %p641_p5 = por %p640_p0, %p639_p11 }
  0x67   : > { %p642_p9 = pnand %p641_p5, %p635_p12 }
 0x135   : > { %v492_v6 = vpop.f32.mrb[0].mxu0 }
 0x136   : > { %v332_v7 = vadd.f32 %v492_v6, %v472_v5  ;;  %v326_v8 = vpop.f32.mrb[1].mxu0 }
 0x137   : > { %v327_v9 = vadd.f32 %v472_v5, %v326_v8 }
 0x138   : > { %336 = vst [vmem:[%s236_s11 + $0x8] sm:$0xff] %v332_v7 }
 0x139   : > { %335 = vst [vmem:[%s236_s11] sm:$0xff] %v327_v9 }
 0x13a   : > { %645 = shalt.err (!%p642_p9)
}
 0x13b   : > { %s646_s29 = scalar_lea.hbm %s928_s26, 256  ;;  %s650_s24 = scalar_lea.hbm %s980_s3, 512 }
 0x13c   : > { %p647_p1 = scmp.ne.s32.totalorder %s928_s26, %s646_s29  ;;  %p651_p7 = scmp.lt.u32.totalorder %s928_s26, %s980_s3 }
 0x13d   : > { %p652_p4 = scmp.lt.u32.totalorder %s650_s24, %s646_s29  ;;  %p654_p6 = scmp.lt.u32.totalorder %s646_s29, %s928_s26 }
 0x13e   : > { %p648_p2 = pnand %p647_p1, %p846_p10 }
 0x13f   : > { %p653_p13 = por %p652_p4, %p651_p7 }
 0x140   : > { %p649_p3 = pneg %p648_p2 }
 0x141   : > { %p655_p8 = por %p654_p6, %p653_p13 }
 0x143   : > { %p656_p12 = pnand %p655_p8, %p649_p3 }
 0x145   : > { %659 = shalt.err (!%p656_p12)
}
 0x146   : > { %s725_s11 = smov 128   ;;  %s726_s18 = smov 8  }
 0x147   : > { %503 = dma.vmem_to_hbm [thread:$0]  (%p846_p10), %s923_s9, 256, %s928_s26, %s338_s21, %s725_s11, %s725_s11, %s726_s18  }
 0x148 PF: > { %s368_s25 = sand.u32 1, %s698_s12   ;;  %p998_p11 = scmp.ne.s32.totalorder %s988_s23, 0 }
 0x149   : > { %p999_p0 = scmp.ge.s32.totalorder %s718_s17, 2  ;;  %s369_s8 = scalar_lea.sflag [#allocation4], %s368_s25 }
 0x14b   : > { %p514_p5 = pnand %p999_p0, %p998_p11 }
 0x14d   : > { %693 = dma.done.wait (!%p514_p5), %s369_s8, 256  }
 0x14e   : > { %695 = vsyncadd (!%p514_p5), %s369_s8, 4294967040  ;;  %s20_s17 = sadd.s32 1, %s718_s17   ;;  %s1000_s12 = smov %s702_s13 }
 0x14f   : > { %p17_p9 = scmp.ge.s32.totalorder %s20_s17, 4   ;;  %s1001_s13 = smov %s706_s14 }
 0x150   : > { %s1002_s14 = smov %s855_s5  ;;  %s1003_s15 = smov %s714_s16 }
 0x151   : > { %s1004_s16 = smov %s1006_s28  ;;  %19 = sbr.rel (!%p17_p9) target bundleno = 7 (0x7), region = 86 }
 0x158   :  { %374 = vsyncpa [#allocation3], 1 }
 0x159   :  { %376 = vsyncpa [#allocation3 + $0x1], 1 }
 0x15a   :  { %377 = vsyncpa [#allocation6], 1 }
 0x15b   :  { %379 = vsyncpa [#allocation6 + $0x1], 1 }
 0x15c   :  { %380 = vsyncpa [#allocation4], 1 }
 0x15d   :  { %382 = vsyncpa [#allocation4 + $0x1], 1 }

</bundles_post_ra>
